<compile_context>
chip_gen: v5e
topology: v5e:2x2
jax: 0.10.0
libtpu: 0.0.40
codegen_flags: <defaults>
</compile_context>

<pallas_src>
import jax
import jax.numpy as jnp
from jax.experimental import pallas as pl
from jax.experimental.pallas import tpu as pltpu


def _round_up(x, m):
    return ((x + m - 1) // m) * m


def _mlp_kernel(x_ref, w1_ref, w2_ref, b_ref, o_ref):
    # x:  [TB, D]  activation tile
    # w1: [D,  C]  linear_1 weight, pre-transposed (K-major for x @ w1)
    # w2: [C,  C]  linear_2 weight, pre-transposed (K-major for h @ w2)
    # b:  [2,  C]  packed biases: row 0 = b1, row 1 = b2
    x = x_ref[...]

    # Linear 1 + bias + ReLU: [TB, C]
    h = jnp.dot(x, w1_ref[...], preferred_element_type=jnp.float32)
    h = jnp.maximum(h + b_ref[0:1, :], 0.0)

    # Dropout (eval mode) -> identity.
    # TODO(synk): training-mode dropout (random mask + 1/(1-p) scaling) not implemented.

    # Linear 2 + bias: [TB, C]
    y = jnp.dot(h, w2_ref[...], preferred_element_type=jnp.float32)
    o_ref[...] = (y + b_ref[1:2, :]).astype(o_ref.dtype)


def prepare_wine_params(w1, b1, w2, b2):
    """One-time parameter prep (hoist out of the per-call hot path).

    w1: [C, D] PyTorch layout -> [D, C];  w2: [C, C] -> [C, C] K-major;
    biases packed into a single [2, C] operand."""
    w1t = jnp.asarray(w1, jnp.float32).T                     # [D, C]
    w2t = jnp.asarray(w2, jnp.float32).T                     # [C, C]
    bb = jnp.stack([jnp.asarray(b1, jnp.float32),
                    jnp.asarray(b2, jnp.float32)])           # [2, C]
    return w1t, w2t, bb


def wine_mlp_forward(x, w1t, w2t, bb, *, block_b=None):
    """x: [B, D]; w1t: [D, C]; w2t: [C, C]; bb: [2, C].  Returns [B, C] f32."""
    B, D = x.shape
    C = w1t.shape[1]

    if block_b is None:
        if B <= 512:
            block_b = B                                  # gridless fast path
        else:
            # >=2 tiles so the parallel batch axis can split across v7x's two
            # TensorCores; cap tile rows so double-buffered x/out stays tiny
            # relative to scoped VMEM on every generation.
            block_b = min(4096, _round_up(pl.cdiv(B, 2), 8))

    n_blocks = pl.cdiv(B, block_b)

    if n_blocks <= 1:
        # Whole batch in one tile: no grid, no pipeline machinery.
        return pl.pallas_call(
            _mlp_kernel,
            out_shape=jax.ShapeDtypeStruct((B, C), jnp.float32),
            in_specs=[pl.BlockSpec(memory_space=pltpu.MemorySpace.VMEM)] * 4,
            out_specs=pl.BlockSpec(memory_space=pltpu.MemorySpace.VMEM),
        )(x, w1t, w2t, bb)

    # Batch-tiled pipeline.  Weights/biases use constant index_maps so they are
    # fetched once and stay resident; only x/out tiles stream per grid step.
    return pl.pallas_call(
        _mlp_kernel,
        out_shape=jax.ShapeDtypeStruct((B, C), jnp.float32),
        grid_spec=pltpu.PrefetchScalarGridSpec(
            num_scalar_prefetch=0,
            grid=(n_blocks,),
            in_specs=[
                pl.BlockSpec((block_b, D), lambda i: (i, 0)),   # x tile
                pl.BlockSpec((D, C), lambda i: (0, 0)),         # w1 (resident)
                pl.BlockSpec((C, C), lambda i: (0, 0)),         # w2 (resident)
                pl.BlockSpec((2, C), lambda i: (0, 0)),         # packed biases
            ],
            out_specs=pl.BlockSpec((block_b, C), lambda i: (i, 0)),
        ),
        compiler_params=pltpu.CompilerParams(
            dimension_semantics=("parallel",)),   # no carry -> shard over TCs
    )(x, w1t, w2t, bb)


def wine_regression_linear(x, w1, b1, w2, b2, *, block_b=None):
    """Convenience wrapper taking PyTorch-layout params (prep done per call;
    for serving, call prepare_wine_params once and use wine_mlp_forward)."""
    w1t, w2t, bb = prepare_wine_params(w1, b1, w2, b2)
    return wine_mlp_forward(x, w1t, w2t, bb, block_b=block_b)


def _init_linear_params(key, in_features, out_features):
    """Deterministic init mirroring nn.Linear default: U(-1/sqrt(in), 1/sqrt(in))."""
    kw, kb = jax.random.split(key)
    bound = 1.0 / jnp.sqrt(jnp.float32(in_features))
    w = jax.random.uniform(kw, (out_features, in_features), jnp.float32,
                           minval=-bound, maxval=bound)
    b = jax.random.uniform(kb, (out_features,), jnp.float32,
                           minval=-bound, maxval=bound)
    return w, b


if __name__ == "__main__":
    # Shapes implied by the module: input_dim features -> num_classes outputs.
    batch, input_dim, num_classes = 256, 16, 8

    key = jax.random.PRNGKey(0)
    kx, k1, k2 = jax.random.split(key, 3)

    x = jax.random.normal(kx, (batch, input_dim), jnp.float32)
    w1, b1 = _init_linear_params(k1, input_dim, num_classes)
    w2, b2 = _init_linear_params(k2, num_classes, num_classes)

    # One-time weight prep (hoisted out of the hot path).
    w1t, w2t, bb = prepare_wine_params(w1, b1, w2, b2)

    ref_fn = lambda xx: jnp.maximum(xx @ w1.T + b1, 0.0) @ w2.T + b2

    # Tiled path: 2 grid steps, batch axis parallel (two-TC sharding on v7x).
    out = jax.block_until_ready(wine_mlp_forward(x, w1t, w2t, bb, block_b=128))
    assert out.shape == (batch, num_classes)
    assert jnp.allclose(out, ref_fn(x), atol=1e-5, rtol=1e-5)

    # Gridless single-block fast path at a tiny batch (default auto block_b).
    x_s = x[:8]
    out_s = jax.block_until_ready(wine_mlp_forward(x_s, w1t, w2t, bb))
    assert out_s.shape == (8, num_classes)
    assert jnp.allclose(out_s, ref_fn(x_s), atol=1e-5, rtol=1e-5)

    # Ragged batch (B not a multiple of block_b): last tile partially written.
    x_r = x[:200]
    out_r = jax.block_until_ready(wine_mlp_forward(x_r, w1t, w2t, bb, block_b=128))
    assert out_r.shape == (200, num_classes)
    assert jnp.allclose(out_r, ref_fn(x_r), atol=1e-5, rtol=1e-5)

    # PyTorch-layout convenience wrapper still matches.
    out_w = jax.block_until_ready(wine_regression_linear(x, w1, b1, w2, b2))
    assert jnp.allclose(out_w, ref_fn(x), atol=1e-5, rtol=1e-5)

    print("KERNEL_OK")
</pallas_src>

<mosaic_0001>
module attributes {stable_mosaic.version = 11 : i64} {
  func.func @_mlp_kernel(%arg0: i32, %arg1: memref<128x16xf32, #tpu.memory_space<vmem>>, %arg2: memref<16x8xf32, #tpu.memory_space<vmem>>, %arg3: memref<8x8xf32, #tpu.memory_space<vmem>>, %arg4: memref<2x8xf32, #tpu.memory_space<vmem>>, %arg5: memref<128x8xf32, #tpu.memory_space<vmem>>) attributes {dimension_semantics = [#tpu.dimension_semantics<parallel>], iteration_bounds = array<i64: 2>, scalar_prefetch = 0 : i64, scratch_operands = 0 : i64, tpu.core_type = #tpu.core_type<tc>, window_params = [{transform_indices = @transform_0, window_bounds = array<i64: 128, 16>}, {pipeline_mode = #tpu.pipeline_mode<synchronous>, transform_indices = @transform_1, window_bounds = array<i64: 16, 8>}, {pipeline_mode = #tpu.pipeline_mode<synchronous>, transform_indices = @transform_2, window_bounds = array<i64: 8, 8>}, {pipeline_mode = #tpu.pipeline_mode<synchronous>, transform_indices = @transform_3, window_bounds = array<i64: 2, 8>}, {transform_indices = @transform_4, window_bounds = array<i64: 128, 8>}]} {
    %c0 = arith.constant 0 : index
    %c0_0 = arith.constant 0 : index
    %0 = vector.load %arg1[%c0, %c0_0] : memref<128x16xf32, #tpu.memory_space<vmem>>, vector<128x16xf32>
    %c0_1 = arith.constant 0 : index
    %c0_2 = arith.constant 0 : index
    %1 = vector.load %arg2[%c0_1, %c0_2] : memref<16x8xf32, #tpu.memory_space<vmem>>, vector<16x8xf32>
    %cst = arith.constant dense<0.000000e+00> : vector<128x8xf32>
    %2 = tpu.matmul %0, %1, %cst {dimension_numbers = #tpu.dot_dimension_numbers<[1], [0], [0], [1], [0, 0, 1, 1], [], []>} : vector<128x16xf32>, vector<16x8xf32>, vector<128x8xf32> -> vector<128x8xf32>
    %c0_3 = arith.constant 0 : index
    %c0_4 = arith.constant 0 : index
    %3 = vector.load %arg4[%c0_3, %c0_4] : memref<2x8xf32, #tpu.memory_space<vmem>>, vector<1x8xf32>
    %4 = vector.broadcast %3 : vector<1x8xf32> to vector<128x8xf32>
    %5 = arith.addf %2, %4 : vector<128x8xf32>
    %cst_5 = arith.constant 0.000000e+00 : f32
    %6 = vector.broadcast %cst_5 : f32 to vector<128x8xf32>
    %7 = arith.maximumf %5, %6 : vector<128x8xf32>
    %c0_6 = arith.constant 0 : index
    %c0_7 = arith.constant 0 : index
    %8 = vector.load %arg3[%c0_6, %c0_7] : memref<8x8xf32, #tpu.memory_space<vmem>>, vector<8x8xf32>
    %cst_8 = arith.constant dense<0.000000e+00> : vector<128x8xf32>
    %9 = tpu.matmul %7, %8, %cst_8 {dimension_numbers = #tpu.dot_dimension_numbers<[1], [0], [0], [1], [0, 0, 1, 1], [], []>} : vector<128x8xf32>, vector<8x8xf32>, vector<128x8xf32> -> vector<128x8xf32>
    %c1 = arith.constant 1 : index
    %c0_9 = arith.constant 0 : index
    %10 = vector.load %arg4[%c1, %c0_9] : memref<2x8xf32, #tpu.memory_space<vmem>>, vector<1x8xf32>
    %11 = vector.broadcast %10 : vector<1x8xf32> to vector<128x8xf32>
    %12 = arith.addf %9, %11 : vector<128x8xf32>
    %c0_10 = arith.constant 0 : index
    %c0_11 = arith.constant 0 : index
    %13 = vector.load %arg5[%c0_10, %c0_11] : memref<128x8xf32, #tpu.memory_space<vmem>>, vector<128x8xf32>
    tpu.vector_store %arg5[%c0_10, %c0_11], %12 {strides = array<i32>} : memref<128x8xf32, #tpu.memory_space<vmem>>, vector<128x8xf32>,
    return
  }
  func.func @transform_0(%arg0: i32) -> (i32, i32) {
    %c0_i32 = arith.constant 0 : i32
    %c0_i32_0 = arith.constant 0 : i32
    return %arg0, %c0_i32 : i32, i32
  }
  func.func @transform_1(%arg0: i32) -> (i32, i32) {
    %c0_i32 = arith.constant 0 : i32
    %c0_i32_0 = arith.constant 0 : i32
    %c0_i32_1 = arith.constant 0 : i32
    return %c0_i32, %c0_i32_0 : i32, i32
  }
  func.func @transform_2(%arg0: i32) -> (i32, i32) {
    %c0_i32 = arith.constant 0 : i32
    %c0_i32_0 = arith.constant 0 : i32
    %c0_i32_1 = arith.constant 0 : i32
    return %c0_i32, %c0_i32_0 : i32, i32
  }
  func.func @transform_3(%arg0: i32) -> (i32, i32) {
    %c0_i32 = arith.constant 0 : i32
    %c0_i32_0 = arith.constant 0 : i32
    %c0_i32_1 = arith.constant 0 : i32
    return %c0_i32, %c0_i32_0 : i32, i32
  }
  func.func @transform_4(%arg0: i32) -> (i32, i32) {
    %c0_i32 = arith.constant 0 : i32
    %c0_i32_0 = arith.constant 0 : i32
    return %arg0, %c0_i32 : i32, i32
  }
}

</mosaic_0001>

<bundles_post_ra>
// kernel: tpu_custom_call.1
= control target key start
LH: loop header
LB: loop body
LE: loop exit
PB: predicated region body
PF: predicated region fallthrough
CT: control target
= control target key end

     0   :  { %s629_s15 = smov 0   ;;  %s734_s0 = inlined_call_operand.vmem [shape: f32[256,16], index: 0, kind: input, shape index: {}]   ;;  %s735_s1 = inlined_call_operand.vmem [shape: f32[16,8], index: 1, kind: input, shape index: {}]   ;;  %s736_s2 = inlined_call_operand.vmem [shape: f32[8,8], index: 2, kind: input, shape index: {}]   ;;  %s737_s3 = inlined_call_operand.vmem [shape: f32[2,8], index: 3, kind: input, shape index: {}]   ;;  %s738_s4 = inlined_call_operand.vmem [shape: f32[256,8], index: 4, kind: output, shape index: {}]  }
   0x1 LB: > { %s540_s16 = sadd.s32 4294967295, %s602_s15   ;;  %p544_p0 = scmp.ge.s32.totalorder %s602_s15, 1  ;;  %s602_s15 = sphi %s629_s15, %s14_s15  }
   0x2   : > { %p163_p1 = scmp.lt.s32.totalorder %s602_s15, 3 }
   0x4   : > { %p164_p2 = pnand %p544_p0, %p163_p1 }
   0x5   : > { %s545_s21 = sshll.u32 (!%p164_p2), %s540_s16, 4 }
   0x6   : > { %167 = sbr.rel (%p164_p2) target bundleno = 343 (0x157), region = 36  ;;  %p190_p3 = scmp.lt.s32.totalorder (!%p164_p2), %s545_s21, 31 }
   0xb   : > { %v218_v0 = vld [vmem:[%s735_s1 + $0x8] sm:$0xff]  ;;  %v217_v1 = vld [vmem:[%s735_s1] sm:$0xff]  ;;  %s740_s21 = smov (!%p190_p3, %s545_s21), 31  ;;  %vm221_vm0 = vcmask 130048   ;;  %vm354_vm1 = vcmask 64512  }
   0xc   : > { %284 = vmatpush.msra.mxu0 %v218_v0  ;;  %583 = vmatpush.msra.mxu2 %v218_v0  ;;  %s546_s22 = sshll.u32 %s740_s21, 3  ;;  %v351_v18 = vld [vmem:[%s736_s2] sm:$0xff] }
   0xd   : > { %s193_s25 = scalar_lea.vmem %s734_s0, %s546_s22  ;;  %418 = vmatpush.msra.mxu1 %v351_v18  ;;  %585 = vmatpush.msra.mxu3 %v351_v18  ;;  %v594_v19 = vld [vmem:[%s737_s3] ss:$0 sm:$0xff]  ;;  %s697_s8 = scalar_lea.vmem %s738_s4, %s546_s22 }
   0xe   : > { %285 = vmatpush.msra.mxu0 %v217_v1  ;;  %584 = vmatpush.msra.mxu2 %v217_v1  ;;  %v201_v2 = vld [vmem:[%s193_s25] sm:$0xff]  ;;  %v202_v4 = vld [vmem:[%s193_s25 + $0x8] sm:$0xff]  ;;  %v203_v6 = vld [vmem:[%s193_s25 + $0x10] sm:$0xff] }
   0xf   : > { %v209_v3 = vld [vmem:[%s193_s25 + $0x40] sm:$0xff]  ;;  %549 = vmatmul.msk.f32.vlgmr.msra.gmra.mxu0 %vm221_vm0, %v201_v2  ;;  %v210_v5 = vld [vmem:[%s193_s25 + $0x48] sm:$0xff]  ;;  %v211_v7 = vld [vmem:[%s193_s25 + $0x50] sm:$0xff] }
  0x10   : > { %557 = vmatmul.msk.f32.vlgmr.msra.gmra.mxu2 %vm221_vm0, %v209_v3  ;;  %v204_v8 = vld [vmem:[%s193_s25 + $0x18] sm:$0xff]  ;;  %v205_v10 = vld [vmem:[%s193_s25 + $0x20] sm:$0xff]  ;;  %v206_v12 = vld [vmem:[%s193_s25 + $0x28] sm:$0xff] }
  0x11   : > { %v212_v9 = vld [vmem:[%s193_s25 + $0x58] sm:$0xff]  ;;  %v213_v11 = vld [vmem:[%s193_s25 + $0x60] sm:$0xff]  ;;  %v214_v13 = vld [vmem:[%s193_s25 + $0x68] sm:$0xff] }
  0x12   : > { %v207_v14 = vld [vmem:[%s193_s25 + $0x30] sm:$0xff]  ;;  %v208_v16 = vld [vmem:[%s193_s25 + $0x38] sm:$0xff] }
  0x13   : > { %v215_v15 = vld [vmem:[%s193_s25 + $0x70] sm:$0xff]  ;;  %v216_v17 = vld [vmem:[%s193_s25 + $0x78] sm:$0xff] }
  0x17   : > { %550 = vmatmul.msk.f32.gmra.mxu0 %vm221_vm0, %v202_v4  ;;  %v595_v4 = vld [vmem:[%s737_s3 + $0x1] ss:$0 sm:$0xff] }
  0x18   : > { %558 = vmatmul.msk.f32.gmra.mxu2 %vm221_vm0, %v210_v5 }
  0x1f   : > { %551 = vmatmul.msk.f32.gmra.mxu0 %vm221_vm0, %v203_v6 }
  0x20   : > { %559 = vmatmul.msk.f32.gmra.mxu2 %vm221_vm0, %v211_v7 }
  0x27   : > { %552 = vmatmul.msk.f32.gmra.mxu0 %vm221_vm0, %v204_v8 }
  0x28   : > { %560 = vmatmul.msk.f32.gmra.mxu2 %vm221_vm0, %v212_v9 }
  0x2f   : > { %553 = vmatmul.msk.f32.gmra.mxu0 %vm221_vm0, %v205_v10 }
  0x30   : > { %561 = vmatmul.msk.f32.gmra.mxu2 %vm221_vm0, %v213_v11 }
  0x37   : > { %554 = vmatmul.msk.f32.gmra.mxu0 %vm221_vm0, %v206_v12 }
  0x38   : > { %562 = vmatmul.msk.f32.gmra.mxu2 %vm221_vm0, %v214_v13 }
  0x3f   : > { %555 = vmatmul.msk.f32.gmra.mxu0 %vm221_vm0, %v207_v14 }
  0x40   : > { %563 = vmatmul.msk.f32.gmra.mxu2 %vm221_vm0, %v215_v15 }
  0x47   : > { %556 = vmatmul.msk.f32.gmra.mxu0 %vm221_vm0, %v208_v16 }
  0x48   : > { %564 = vmatmul.msk.f32.gmra.mxu2 %vm221_vm0, %v216_v17 }
  0x8c   : > { %v287_v20 = vpop.f32.mrf.mxu0 }
  0x8d   : > { %v288_v21 = vadd.f32 %v594_v19, %v287_v20 }
  0x8f   : > { %v335_v22 = vmax.f32 %v288_v21, 0.0 }
  0x91   : > { %565 = vmatmul.msk.f32.vlgmr.msra.gmra.mxu1 %vm354_vm1, %v335_v22 }
  0x93   : > { %v311_v23 = vpop.f32.mrf.mxu2 }
  0x94   : > { %v290_v24 = vpop.f32.mrf.mxu0  ;;  %v312_v0 = vadd.f32 %v594_v19, %v311_v23 }
  0x95   : > { %v291_v25 = vadd.f32 %v594_v19, %v290_v24 }
  0x96   : > { %v343_v3 = vmax.f32 %v312_v0, 0.0 }
  0x97   : > { %v336_v26 = vmax.f32 %v291_v25, 0.0 }
  0x99   : > { %566 = vmatmul.msk.f32.gmra.mxu1 %vm354_vm1, %v336_v26 }
  0x9b   : > { %v314_v27 = vpop.f32.mrf.mxu2 }
  0x9c   : > { %v315_v28 = vadd.f32 %v594_v19, %v314_v27  ;;  %v293_v29 = vpop.f32.mrf.mxu0 }
  0x9d   : > { %v294_v31 = vadd.f32 %v594_v19, %v293_v29 }
  0x9e   : > { %v344_v30 = vmax.f32 %v315_v28, 0.0 }
  0x9f   : > { %v337_v32 = vmax.f32 %v294_v31, 0.0 }
  0xa0   : > { %574 = vmatmul.msk.f32.vlgmr.msra.gmra.mxu3 %vm354_vm1, %v344_v30 }
  0xa1   : > { %567 = vmatmul.msk.f32.gmra.mxu1 %vm354_vm1, %v337_v32 }
  0xa3   : > { %v317_v33 = vpop.f32.mrf.mxu2 }
  0xa4   : > { %v318_v34 = vadd.f32 %v594_v19, %v317_v33  ;;  %v296_v35 = vpop.f32.mrf.mxu0 }
  0xa5   : > { %v297_v37 = vadd.f32 %v594_v19, %v296_v35 }
  0xa6   : > { %v345_v36 = vmax.f32 %v318_v34, 0.0 }
  0xa7   : > { %v338_v38 = vmax.f32 %v297_v37, 0.0 }
  0xa8   : > { %575 = vmatmul.msk.f32.gmra.mxu3 %vm354_vm1, %v345_v36 }
  0xa9   : > { %568 = vmatmul.msk.f32.gmra.mxu1 %vm354_vm1, %v338_v38 }
  0xab   : > { %v320_v39 = vpop.f32.mrf.mxu2 }
  0xac   : > { %v321_v40 = vadd.f32 %v594_v19, %v320_v39  ;;  %v299_v41 = vpop.f32.mrf.mxu0 }
  0xad   : > { %v300_v43 = vadd.f32 %v594_v19, %v299_v41 }
  0xae   : > { %v346_v42 = vmax.f32 %v321_v40, 0.0 }
  0xaf   : > { %v339_v44 = vmax.f32 %v300_v43, 0.0 }
  0xb0   : > { %576 = vmatmul.msk.f32.gmra.mxu3 %vm354_vm1, %v346_v42 }
  0xb1   : > { %569 = vmatmul.msk.f32.gmra.mxu1 %vm354_vm1, %v339_v44 }
  0xb3   : > { %v323_v45 = vpop.f32.mrf.mxu2 }
  0xb4   : > { %v324_v46 = vadd.f32 %v594_v19, %v323_v45  ;;  %v302_v47 = vpop.f32.mrf.mxu0 }
  0xb5   : > { %v303_v49 = vadd.f32 %v594_v19, %v302_v47 }
  0xb6   : > { %v347_v48 = vmax.f32 %v324_v46, 0.0 }
  0xb7   : > { %v340_v50 = vmax.f32 %v303_v49, 0.0 }
  0xb8   : > { %577 = vmatmul.msk.f32.gmra.mxu3 %vm354_vm1, %v347_v48 }
  0xb9   : > { %570 = vmatmul.msk.f32.gmra.mxu1 %vm354_vm1, %v340_v50 }
  0xbb   : > { %v326_v51 = vpop.f32.mrf.mxu2 }
  0xbc   : > { %v327_v52 = vadd.f32 %v594_v19, %v326_v51  ;;  %v305_v53 = vpop.f32.mrf.mxu0 }
  0xbd   : > { %v306_v55 = vadd.f32 %v594_v19, %v305_v53 }
  0xbe   : > { %v348_v54 = vmax.f32 %v327_v52, 0.0 }
  0xbf   : > { %v341_v56 = vmax.f32 %v306_v55, 0.0 }
  0xc0   : > { %578 = vmatmul.msk.f32.gmra.mxu3 %vm354_vm1, %v348_v54 }
  0xc1   : > { %571 = vmatmul.msk.f32.gmra.mxu1 %vm354_vm1, %v341_v56 }
  0xc3   : > { %v329_v57 = vpop.f32.mrf.mxu2 }
  0xc4   : > { %v330_v58 = vadd.f32 %v594_v19, %v329_v57  ;;  %v308_v59 = vpop.f32.mrf.mxu0 }
  0xc5   : > { %v309_v61 = vadd.f32 %v594_v19, %v308_v59 }
  0xc6   : > { %v349_v60 = vmax.f32 %v330_v58, 0.0 }
  0xc7   : > { %v342_v62 = vmax.f32 %v309_v61, 0.0 }
  0xc8   : > { %579 = vmatmul.msk.f32.gmra.mxu3 %vm354_vm1, %v349_v60 }
  0xc9   : > { %572 = vmatmul.msk.f32.gmra.mxu1 %vm354_vm1, %v342_v62 }
  0xcb   : > { %v332_v63 = vpop.f32.mrf.mxu2 }
  0xcc   : > { %v333_v1 = vadd.f32 %v594_v19, %v332_v63 }
  0xce   : > { %v350_v2 = vmax.f32 %v333_v1, 0.0 }
  0xd0   : > { %580 = vmatmul.msk.f32.gmra.mxu3 %vm354_vm1, %v350_v2 }
  0xd1   : > { %573 = vmatmul.msk.f32.gmra.mxu1 %vm354_vm1, %v343_v3 }
 0x10e   : > { %v420_v5 = vpop.f32.mrf.mxu1 }
 0x10f   : > { %v421_v6 = vadd.f32 %v595_v4, %v420_v5 }
 0x111   : > { %468 = vst.msk [vmem:[%s697_s8] sm:$0xff] %vm354_vm1, %v421_v6 }
 0x116   : > { %v423_v7 = vpop.f32.mrf.mxu1 }
 0x117   : > { %v424_v8 = vadd.f32 %v595_v4, %v423_v7 }
 0x119   : > { %469 = vst.msk [vmem:[%s697_s8 + $0x8] sm:$0xff] %vm354_vm1, %v424_v8 }
 0x11e   : > { %v426_v9 = vpop.f32.mrf.mxu1 }
 0x11f   : > { %v427_v10 = vadd.f32 %v595_v4, %v426_v9 }
 0x121   : > { %470 = vst.msk [vmem:[%s697_s8 + $0x10] sm:$0xff] %vm354_vm1, %v427_v10 }
 0x123   : > { %v447_v11 = vpop.f32.mrf.mxu3 }
 0x124   : > { %v448_v12 = vadd.f32 %v595_v4, %v447_v11 }
 0x126   : > { %477 = vst.msk [vmem:[%s697_s8 + $0x48] sm:$0xff] %vm354_vm1, %v448_v12  ;;  %v429_v13 = vpop.f32.mrf.mxu1 }
 0x127   : > { %v430_v14 = vadd.f32 %v595_v4, %v429_v13 }
 0x129   : > { %471 = vst.msk [vmem:[%s697_s8 + $0x18] sm:$0xff] %vm354_vm1, %v430_v14 }
 0x12b   : > { %v450_v15 = vpop.f32.mrf.mxu3 }
 0x12c   : > { %v451_v16 = vadd.f32 %v595_v4, %v450_v15 }
 0x12e   : > { %478 = vst.msk [vmem:[%s697_s8 + $0x50] sm:$0xff] %vm354_vm1, %v451_v16  ;;  %v432_v17 = vpop.f32.mrf.mxu1 }
 0x12f   : > { %v433_v18 = vadd.f32 %v595_v4, %v432_v17 }
 0x131   : > { %472 = vst.msk [vmem:[%s697_s8 + $0x20] sm:$0xff] %vm354_vm1, %v433_v18 }
 0x133   : > { %v453_v19 = vpop.f32.mrf.mxu3 }
 0x134   : > { %v454_v20 = vadd.f32 %v595_v4, %v453_v19 }
 0x136   : > { %479 = vst.msk [vmem:[%s697_s8 + $0x58] sm:$0xff] %vm354_vm1, %v454_v20  ;;  %v435_v21 = vpop.f32.mrf.mxu1 }
 0x137   : > { %v436_v22 = vadd.f32 %v595_v4, %v435_v21 }
 0x139   : > { %473 = vst.msk [vmem:[%s697_s8 + $0x28] sm:$0xff] %vm354_vm1, %v436_v22 }
 0x13b   : > { %v456_v23 = vpop.f32.mrf.mxu3 }
 0x13c   : > { %v457_v24 = vadd.f32 %v595_v4, %v456_v23 }
 0x13e   : > { %480 = vst.msk [vmem:[%s697_s8 + $0x60] sm:$0xff] %vm354_vm1, %v457_v24  ;;  %v438_v25 = vpop.f32.mrf.mxu1 }
 0x13f   : > { %v439_v26 = vadd.f32 %v595_v4, %v438_v25 }
 0x141   : > { %474 = vst.msk [vmem:[%s697_s8 + $0x30] sm:$0xff] %vm354_vm1, %v439_v26 }
 0x143   : > { %v459_v27 = vpop.f32.mrf.mxu3 }
 0x144   : > { %v460_v28 = vadd.f32 %v595_v4, %v459_v27 }
 0x146   : > { %481 = vst.msk [vmem:[%s697_s8 + $0x68] sm:$0xff] %vm354_vm1, %v460_v28  ;;  %v441_v29 = vpop.f32.mrf.mxu1 }
 0x147   : > { %v442_v30 = vadd.f32 %v595_v4, %v441_v29 }
 0x149   : > { %475 = vst.msk [vmem:[%s697_s8 + $0x38] sm:$0xff] %vm354_vm1, %v442_v30 }
 0x14b   : > { %v462_v31 = vpop.f32.mrf.mxu3 }
 0x14c   : > { %v463_v32 = vadd.f32 %v595_v4, %v462_v31 }
 0x14e   : > { %482 = vst.msk [vmem:[%s697_s8 + $0x70] sm:$0xff] %vm354_vm1, %v463_v32  ;;  %v444_v33 = vpop.f32.mrf.mxu1 }
 0x14f   : > { %v445_v34 = vadd.f32 %v595_v4, %v444_v33 }
 0x151   : > { %476 = vst.msk [vmem:[%s697_s8 + $0x40] sm:$0xff] %vm354_vm1, %v445_v34 }
 0x153   : > { %v465_v35 = vpop.f32.mrf.mxu3 }
 0x154   : > { %v466_v36 = vadd.f32 %v595_v4, %v465_v35 }
 0x156   : > { %483 = vst.msk [vmem:[%s697_s8 + $0x78] sm:$0xff] %vm354_vm1, %v466_v36 }
 0x157 PF: > { %s14_s15 = sadd.s32 1, %s602_s15  }
 0x158   : > { %p11_p4 = scmp.ge.s32.totalorder %s14_s15, 4  }
 0x15a   :  { %13 = sbr.rel (!%p11_p4) target bundleno = 1 (0x1), region = 66 }

</bundles_post_ra>
